<compile_context>
chip_gen: v7x
topology: tpu7x:2x2x1
jax: 0.10.0
libtpu: 0.0.40
codegen_flags: <defaults>
</compile_context>

<pallas_src>
import functools

import jax
import jax.numpy as jnp
from jax import lax
from jax.experimental import pallas as pl
from jax.experimental.pallas import tpu as pltpu

_LANES = 128
_SUBLANES = 8
_MAX_BLOCK_ROWS = 4096  # (4096, 128) f32 = 2 MiB per input block.


def _focal_elementwise(p, t, alpha, gamma, hard_labels):
    """Elementwise focal loss matching torch.nn.functional.binary_cross_entropy
    semantics (log terms clamped at -100).  Computes in f32 (cast in-kernel)."""
    p = p.astype(jnp.float32)
    t = t.astype(jnp.float32)

    if hard_labels:
        # 1 transcendental / element.  Exact for t in {0, 1}: pt is the true
        # probability of the correct class, and -max(log(pt), -100) equals the
        # clamped per-term BCE torch computes.
        pt = p * t + (1.0 - p) * (1.0 - t)
        bce = -jnp.maximum(jnp.log(pt), -100.0)
    else:
        # Exact torch semantics (also valid for soft targets): 3 transcendentals.
        log_p = jnp.maximum(jnp.log(p), -100.0)
        log_1mp = jnp.maximum(jnp.log(1.0 - p), -100.0)
        bce = -(t * log_p + (1.0 - t) * log_1mp)
        pt = jnp.exp(-bce)

    alpha_t = alpha * t + (1.0 - alpha) * (1.0 - t)
    one_m_pt = 1.0 - pt

    g = float(gamma)
    if g.is_integer() and 0.0 <= g <= 8.0:
        # Integer gamma (default 2.0): repeated VPU multiplies instead of an
        # exp+log pair on the single-slot EUP.
        ig = int(g)
        if ig == 0:
            focal_w = jnp.ones_like(one_m_pt)
        else:
            focal_w = one_m_pt
            for _ in range(ig - 1):
                focal_w = focal_w * one_m_pt
    else:
        # Generic (1 - pt) ** gamma, robust to one_m_pt == 0.
        focal_w = jnp.where(
            one_m_pt > 0.0,
            jnp.exp(g * jnp.log(jnp.maximum(one_m_pt, 1e-38))),
            0.0,
        )
    return alpha_t * focal_w * bce


def _accumulate(o_ref, f, block_rows):
    if block_rows % _SUBLANES == 0:
        # Vector partial sums: pure VPU adds into the resident (8, 128) output
        # block; the single cross-lane reduce happens once, outside the kernel.
        o_ref[...] += f.reshape(block_rows // _SUBLANES, _SUBLANES, _LANES).sum(axis=0)
    else:
        # Tiny-input fallback (whole problem is one block with < 8-aligned
        # rows), so the cross-lane reduce runs exactly once.
        o_ref[0, 0] += jnp.sum(f)


def _focal_reduce_kernel(x_ref, t_ref, o_ref, *, alpha, gamma, hard_labels,
                         full_valid_rows, tail_lanes, block_rows,
                         blocks_per_split):
    s = pl.program_id(0)   # partial-sum split (one per TC on v7x)
    i = pl.program_id(1)   # reduction step within the split (arbitrary)

    @pl.when(i == 0)
    def _():
        o_ref[...] = jnp.zeros_like(o_ref)

    # Logical row-block index.  The input index_map clamps the physical block
    # so the overhang iteration (odd block count split 2 ways) re-reads a valid
    # block; the unclamped value here makes the mask zero that contribution.
    blk = s * blocks_per_split + i

    # Scalar test: is every (row, lane) of this logical block valid?
    is_full = (blk + 1) * block_rows <= full_valid_rows

    @pl.when(is_full)
    def _():
        # Steady-state fast path: no iotas, no compares, no selects.
        f = _focal_elementwise(x_ref[...], t_ref[...], alpha, gamma, hard_labels)
        _accumulate(o_ref, f, block_rows)

    @pl.when(jnp.logical_not(is_full))
    def _():
        # Tail / overhang path: mask built from int32 *row* indices (supports
        # up to 2**31-1 rows, i.e. ~2.7e11 elements).
        row_ids = lax.broadcasted_iota(jnp.int32, (block_rows, _LANES), 0)
        g_rows = blk * block_rows + row_ids
        valid = g_rows < full_valid_rows
        if tail_lanes > 0:
            col_ids = lax.broadcasted_iota(jnp.int32, (block_rows, _LANES), 1)
            valid = valid | ((g_rows == full_valid_rows) & (col_ids < tail_lanes))
        # (p=1, t=1) contributes exactly zero loss -> masked slots drop out.
        p = jnp.where(valid, x_ref[...].astype(jnp.float32), 1.0)
        t = jnp.where(valid, t_ref[...].astype(jnp.float32), 1.0)
        f = _focal_elementwise(p, t, alpha, gamma, hard_labels)
        _accumulate(o_ref, f, block_rows)


def _focal_none_kernel(x_ref, t_ref, o_ref, *, alpha, gamma, hard_labels):
    # Out-of-bounds rows of a ragged last block are clipped on writeback, and
    # lane-padding (p=0, t=0) is sliced off in the wrapper, so no mask needed.
    f = _focal_elementwise(x_ref[...], t_ref[...], alpha, gamma, hard_labels)
    o_ref[...] = f.astype(o_ref.dtype)


def _default_num_splits():
    """2 partial-sum splits only where a second TensorCore can take one (v7x)."""
    try:
        kind = jax.devices()[0].device_kind.lower()
    except Exception:
        return 1
    return 2 if "v7" in kind else 1


def focal_loss(inputs, targets, alpha=0.25, gamma=2.0, reduction="mean",
               hard_labels=False):
    """Pallas TPU focal loss.

    inputs:  predicted probabilities, shape [N] or [N, 1] (any float dtype).
    targets: labels, same number of elements (any numeric dtype; bool/int8
        labels are fed as-is and cast in-kernel, saving HBM bytes).
    hard_labels: if True, assume targets are exactly 0/1 and use the
        1-transcendental pt identity.  NOTE: silently diverges from the torch
        reference for soft (non-0/1) targets.  Default False preserves the
        exact torch semantics (pt = exp(-BCE)).
    """
    if reduction not in ("mean", "sum", "none"):
        raise ValueError(f"unknown reduction: {reduction}")

    orig_shape = inputs.shape
    out_dtype = (inputs.dtype if jnp.issubdtype(inputs.dtype, jnp.floating)
                 else jnp.float32)
    x = inputs.reshape(-1)      # free (metadata only)
    t = targets.reshape(-1)     # covers the targets.view_as(inputs) case
    n = int(x.shape[0])

    # Lane-dense (rows, 128) view: free when n % 128 == 0; otherwise pad only
    # the ragged tail up to the next lane boundary (unavoidable for a 2-D view).
    if n % _LANES != 0:
        pad = _LANES - n % _LANES
        x = jnp.pad(x, (0, pad))
        t = jnp.pad(t, (0, pad))
    rows = x.shape[0] // _LANES
    if rows >= 2 ** 31:
        raise ValueError("focal_loss: input too large for int32 row indexing")
    x2 = x.reshape(rows, _LANES)
    t2 = t.reshape(rows, _LANES)

    # Block is either the full row extent (small inputs) or 4096 rows.
    block_rows = min(_MAX_BLOCK_ROWS, rows)
    num_row_blocks = pl.cdiv(rows, block_rows)

    vmem_params = dict(vmem_limit_bytes=32 * 1024 * 1024)

    if reduction == "none":
        kernel = functools.partial(
            _focal_none_kernel, alpha=float(alpha), gamma=float(gamma),
            hard_labels=bool(hard_labels))
        out = pl.pallas_call(
            kernel,
            out_shape=jax.ShapeDtypeStruct((rows, _LANES), out_dtype),
            grid_spec=pltpu.PrefetchScalarGridSpec(
                num_scalar_prefetch=0,
                grid=(num_row_blocks,),
                in_specs=[pl.BlockSpec((block_rows, _LANES), lambda i: (i, 0)),
                          pl.BlockSpec((block_rows, _LANES), lambda i: (i, 0))],
                out_specs=pl.BlockSpec((block_rows, _LANES), lambda i: (i, 0)),
            ),
            compiler_params=pltpu.CompilerParams(
                dimension_semantics=("parallel",), **vmem_params),
        )(x2, t2)
        return out.reshape(-1)[:n].reshape(orig_shape)

    # 'mean' / 'sum': split the reduction into independent partial sums only
    # where a second TensorCore exists to take one (v7x); single split elsewhere.
    num_splits = _default_num_splits() if num_row_blocks >= 2 else 1
    blocks_per_split = pl.cdiv(num_row_blocks, num_splits)

    def in_map(s, i):
        # Clamp so the overhang iteration (odd block count) re-reads a valid
        # block; its contribution is fully masked inside the kernel.
        return (jnp.minimum(s * blocks_per_split + i, num_row_blocks - 1), 0)

    kernel = functools.partial(
        _focal_reduce_kernel, alpha=float(alpha), gamma=float(gamma),
        hard_labels=bool(hard_labels),
        full_valid_rows=n // _LANES, tail_lanes=n % _LANES,
        block_rows=int(block_rows), blocks_per_split=int(blocks_per_split))

    partials = pl.pallas_call(
        kernel,
        out_shape=jax.ShapeDtypeStruct((num_splits * _SUBLANES, _LANES),
                                       jnp.float32),
        grid_spec=pltpu.PrefetchScalarGridSpec(
            num_scalar_prefetch=0,
            grid=(num_splits, blocks_per_split),
            in_specs=[pl.BlockSpec((block_rows, _LANES), in_map),
                      pl.BlockSpec((block_rows, _LANES), in_map)],
            out_specs=pl.BlockSpec((_SUBLANES, _LANES), lambda s, i: (s, 0)),
        ),
        compiler_params=pltpu.CompilerParams(
            dimension_semantics=("parallel", "arbitrary"), **vmem_params),
    )(x2, t2)

    total = jnp.sum(partials)   # tiny (<= 2*8*128 elems) final combine
    if reduction == "mean":
        return total / jnp.float32(n)
    return total


def _focal_loss_ref(inputs, targets, alpha=0.25, gamma=2.0, reduction="mean"):
    """Pure-JAX reference mirroring the PyTorch module."""
    p = inputs.astype(jnp.float32)
    t = jnp.reshape(targets.astype(jnp.float32), p.shape)
    log_p = jnp.maximum(jnp.log(p), -100.0)
    log_1mp = jnp.maximum(jnp.log(1.0 - p), -100.0)
    bce = -(t * log_p + (1.0 - t) * log_1mp)
    pt = jnp.exp(-bce)
    alpha_t = alpha * t + (1.0 - alpha) * (1.0 - t)
    f = alpha_t * (1.0 - pt) ** gamma * bce
    if reduction == "mean":
        return jnp.mean(f)
    if reduction == "sum":
        return jnp.sum(f)
    return f


if __name__ == "__main__":
    key = jax.random.PRNGKey(0)
    k1, k2, k3, k4, k5, k6 = jax.random.split(key, 6)

    # Small case: N not a multiple of 128 -> exercises the in-kernel tail mask
    # (masked branch of pl.when) and the [N, 1] input shape.
    n_small = 1000
    p_small = jax.nn.sigmoid(jax.random.normal(k1, (n_small, 1), dtype=jnp.float32))
    t_small = (jax.random.uniform(k2, (n_small, 1)) > 0.5).astype(jnp.float32)

    # Tiny case: rows not a multiple of 8 -> exercises the single-block fallback.
    n_tiny = 256
    p_tiny = jax.nn.sigmoid(jax.random.normal(k3, (n_tiny,), dtype=jnp.float32))
    t_tiny = (jax.random.uniform(k4, (n_tiny,)) > 0.5).astype(jnp.float32)

    # Larger case: 9000 rows -> multiple (4096, 128) blocks with a ragged last
    # block (masked), a mask-free steady state, and (on v7x) the 2-way split
    # with a clamped, fully-masked overhang iteration.
    n_big = 9000 * 128
    p_big = jax.nn.sigmoid(jax.random.normal(k5, (n_big,), dtype=jnp.float32))
    t_big = (jax.random.uniform(k6, (n_big,)) > 0.5).astype(jnp.float32)
    t_big_i8 = t_big.astype(jnp.int8)   # low-byte labels (v5e HBM saver)

    checks = [
        (focal_loss(p_small, t_small, reduction="mean"),
         _focal_loss_ref(p_small, t_small, reduction="mean"), 1e-5),
        (focal_loss(p_small, t_small, reduction="sum"),
         _focal_loss_ref(p_small, t_small, reduction="sum"), 1e-5),
        (focal_loss(p_small, t_small, reduction="none"),
         _focal_loss_ref(p_small, t_small, reduction="none"), 1e-5),
        (focal_loss(p_tiny, t_tiny, reduction="mean"),
         _focal_loss_ref(p_tiny, t_tiny, reduction="mean"), 1e-5),
        (focal_loss(p_big, t_big, reduction="sum"),
         _focal_loss_ref(p_big, t_big, reduction="sum"), 1e-4),
        (focal_loss(p_big, t_big, reduction="mean", hard_labels=True),
         _focal_loss_ref(p_big, t_big, reduction="mean"), 1e-4),
        (focal_loss(p_big, t_big_i8, reduction="mean", hard_labels=True),
         _focal_loss_ref(p_big, t_big, reduction="mean"), 1e-4),
    ]
    for got, want, rtol in checks:
        got = jax.block_until_ready(got)
        assert jnp.allclose(got, want, rtol=rtol, atol=1e-6), (got, want)

    print("KERNEL_OK")
</pallas_src>

<mosaic_0001>
module attributes {stable_mosaic.version = 11 : i64} {
  func.func @_focal_reduce_kernel(%arg0: i32, %arg1: i32, %arg2: memref<8x128xf32, #tpu.memory_space<vmem>>, %arg3: memref<8x128xf32, #tpu.memory_space<vmem>>, %arg4: memref<8x128xf32, #tpu.memory_space<vmem>>) attributes {dimension_semantics = [#tpu.dimension_semantics<parallel>, #tpu.dimension_semantics<arbitrary>], iteration_bounds = array<i64: 1, 1>, scalar_prefetch = 0 : i64, scratch_operands = 0 : i64, tpu.core_type = #tpu.core_type<tc>, window_params = [{transform_indices = @transform_0, window_bounds = array<i64: 8, 128>}, {transform_indices = @transform_1, window_bounds = array<i64: 8, 128>}, {transform_indices = @transform_2, window_bounds = array<i64: 8, 128>}]} {
    %c0_i32 = arith.constant 0 : i32
    %0 = arith.cmpi eq, %arg1, %c0_i32 : i32
    %1 = arith.extui %0 : i1 to i32
    %c0_i32_0 = arith.constant 0 : i32
    %2 = arith.cmpi ne, %1, %c0_i32_0 : i32
    scf.if %2 {
      %cst = arith.constant 0.000000e+00 : f32
      %13 = vector.broadcast %cst : f32 to vector<8x128xf32>
      %c0 = arith.constant 0 : index
      %c0_4 = arith.constant 0 : index
      %14 = vector.load %arg4[%c0, %c0_4] : memref<8x128xf32, #tpu.memory_space<vmem>>, vector<8x128xf32>
      tpu.vector_store %arg4[%c0, %c0_4], %13 {strides = array<i32>} : memref<8x128xf32, #tpu.memory_space<vmem>>, vector<8x128xf32>,
    } else {
    }
    %c1_i32 = arith.constant 1 : i32
    %3 = arith.muli %arg0, %c1_i32 : i32
    %4 = arith.addi %3, %arg1 : i32
    %c1_i32_1 = arith.constant 1 : i32
    %5 = arith.addi %4, %c1_i32_1 : i32
    %c8_i32 = arith.constant 8 : i32
    %6 = arith.muli %5, %c8_i32 : i32
    %c7_i32 = arith.constant 7 : i32
    %7 = arith.cmpi sle, %6, %c7_i32 : i32
    %8 = arith.extui %7 : i1 to i32
    %c0_i32_2 = arith.constant 0 : i32
    %9 = arith.cmpi ne, %8, %c0_i32_2 : i32
    scf.if %9 {
      %c0 = arith.constant 0 : index
      %c0_4 = arith.constant 0 : index
      %13 = vector.load %arg2[%c0, %c0_4] : memref<8x128xf32, #tpu.memory_space<vmem>>, vector<8x128xf32>
      %c0_5 = arith.constant 0 : index
      %c0_6 = arith.constant 0 : index
      %14 = vector.load %arg3[%c0_5, %c0_6] : memref<8x128xf32, #tpu.memory_space<vmem>>, vector<8x128xf32>
      %15 = math.log %13 : vector<8x128xf32>
      %cst = arith.constant -1.000000e+02 : f32
      %16 = vector.broadcast %cst : f32 to vector<8x128xf32>
      %17 = arith.maximumf %15, %16 : vector<8x128xf32>
      %cst_7 = arith.constant 1.000000e+00 : f32
      %18 = vector.broadcast %cst_7 : f32 to vector<8x128xf32>
      %19 = arith.subf %18, %13 : vector<8x128xf32>
      %20 = math.log %19 : vector<8x128xf32>
      %cst_8 = arith.constant -1.000000e+02 : f32
      %21 = vector.broadcast %cst_8 : f32 to vector<8x128xf32>
      %22 = arith.maximumf %20, %21 : vector<8x128xf32>
      %23 = arith.mulf %14, %17 : vector<8x128xf32>
      %cst_9 = arith.constant 1.000000e+00 : f32
      %24 = vector.broadcast %cst_9 : f32 to vector<8x128xf32>
      %25 = arith.subf %24, %14 : vector<8x128xf32>
      %26 = arith.mulf %25, %22 : vector<8x128xf32>
      %27 = arith.addf %23, %26 : vector<8x128xf32>
      %cst_10 = arith.constant 0.000000e+00 : f32
      %28 = vector.broadcast %cst_10 : f32 to vector<8x128xf32>
      %29 = arith.subf %28, %27 : vector<8x128xf32>
      %cst_11 = arith.constant 0.000000e+00 : f32
      %30 = vector.broadcast %cst_11 : f32 to vector<8x128xf32>
      %31 = arith.subf %30, %29 : vector<8x128xf32>
      %32 = math.exp %31 : vector<8x128xf32>
      %cst_12 = arith.constant 2.500000e-01 : f32
      %33 = vector.broadcast %cst_12 : f32 to vector<8x128xf32>
      %34 = arith.mulf %33, %14 : vector<8x128xf32>
      %cst_13 = arith.constant 1.000000e+00 : f32
      %35 = vector.broadcast %cst_13 : f32 to vector<8x128xf32>
      %36 = arith.subf %35, %14 : vector<8x128xf32>
      %cst_14 = arith.constant 7.500000e-01 : f32
      %37 = vector.broadcast %cst_14 : f32 to vector<8x128xf32>
      %38 = arith.mulf %37, %36 : vector<8x128xf32>
      %39 = arith.addf %34, %38 : vector<8x128xf32>
      %cst_15 = arith.constant 1.000000e+00 : f32
      %40 = vector.broadcast %cst_15 : f32 to vector<8x128xf32>
      %41 = arith.subf %40, %32 : vector<8x128xf32>
      %42 = arith.mulf %41, %41 : vector<8x128xf32>
      %43 = arith.mulf %39, %42 : vector<8x128xf32>
      %44 = arith.mulf %43, %29 : vector<8x128xf32>
      %c0_16 = arith.constant 0 : index
      %c0_17 = arith.constant 0 : index
      %45 = vector.load %arg4[%c0_16, %c0_17] : memref<8x128xf32, #tpu.memory_space<vmem>>, vector<8x128xf32>
      %46 = vector.shape_cast %44 : vector<8x128xf32> to vector<1x8x128xf32>
      %cst_18 = arith.constant dense<0.000000e+00> : vector<8x128xf32>
      %47 = vector.multi_reduction <add>, %46, %cst_18 [0] : vector<1x8x128xf32> to vector<8x128xf32>
      %48 = arith.addf %45, %47 : vector<8x128xf32>
      %c0_19 = arith.constant 0 : index
      %c0_20 = arith.constant 0 : index
      %49 = vector.load %arg4[%c0_19, %c0_20] : memref<8x128xf32, #tpu.memory_space<vmem>>, vector<8x128xf32>
      tpu.vector_store %arg4[%c0_19, %c0_20], %48 {strides = array<i32>} : memref<8x128xf32, #tpu.memory_space<vmem>>, vector<8x128xf32>,
    } else {
    }
    %true = arith.constant true
    %10 = arith.xori %7, %true : i1
    %11 = arith.extui %10 : i1 to i32
    %c0_i32_3 = arith.constant 0 : i32
    %12 = arith.cmpi ne, %11, %c0_i32_3 : i32
    scf.if %12 {
      %13 = tpu.iota {dimensions = array<i32: 0>} : vector<8x128xi32>
      %c8_i32_4 = arith.constant 8 : i32
      %14 = arith.muli %4, %c8_i32_4 : i32
      %15 = vector.broadcast %14 : i32 to vector<8x128xi32>
      %16 = arith.addi %15, %13 : vector<8x128xi32>
      %c7_i32_5 = arith.constant 7 : i32
      %17 = vector.broadcast %c7_i32_5 : i32 to vector<8x128xi32>
      %18 = arith.cmpi slt, %16, %17 : vector<8x128xi32>
      %19 = tpu.iota {dimensions = array<i32: 1>} : vector<8x128xi32>
      %c7_i32_6 = arith.constant 7 : i32
      %20 = vector.broadcast %c7_i32_6 : i32 to vector<8x128xi32>
      %21 = arith.cmpi eq, %16, %20 : vector<8x128xi32>
      %c104_i32 = arith.constant 104 : i32
      %22 = vector.broadcast %c104_i32 : i32 to vector<8x128xi32>
      %23 = arith.cmpi slt, %19, %22 : vector<8x128xi32>
      %24 = arith.andi %21, %23 : vector<8x128xi1>
      %25 = arith.ori %18, %24 : vector<8x128xi1>
      %c0 = arith.constant 0 : index
      %c0_7 = arith.constant 0 : index
      %26 = vector.load %arg2[%c0, %c0_7] : memref<8x128xf32, #tpu.memory_space<vmem>>, vector<8x128xf32>
      %cst = arith.constant 1.000000e+00 : f32
      %27 = vector.broadcast %cst : f32 to vector<8x128xf32>
      %28 = arith.select %25, %26, %27 : vector<8x128xi1>, vector<8x128xf32>
      %c0_8 = arith.constant 0 : index
      %c0_9 = arith.constant 0 : index
      %29 = vector.load %arg3[%c0_8, %c0_9] : memref<8x128xf32, #tpu.memory_space<vmem>>, vector<8x128xf32>
      %cst_10 = arith.constant 1.000000e+00 : f32
      %30 = vector.broadcast %cst_10 : f32 to vector<8x128xf32>
      %31 = arith.select %25, %29, %30 : vector<8x128xi1>, vector<8x128xf32>
      %32 = math.log %28 : vector<8x128xf32>
      %cst_11 = arith.constant -1.000000e+02 : f32
      %33 = vector.broadcast %cst_11 : f32 to vector<8x128xf32>
      %34 = arith.maximumf %32, %33 : vector<8x128xf32>
      %cst_12 = arith.constant 1.000000e+00 : f32
      %35 = vector.broadcast %cst_12 : f32 to vector<8x128xf32>
      %36 = arith.subf %35, %28 : vector<8x128xf32>
      %37 = math.log %36 : vector<8x128xf32>
      %cst_13 = arith.constant -1.000000e+02 : f32
      %38 = vector.broadcast %cst_13 : f32 to vector<8x128xf32>
      %39 = arith.maximumf %37, %38 : vector<8x128xf32>
      %40 = arith.mulf %31, %34 : vector<8x128xf32>
      %cst_14 = arith.constant 1.000000e+00 : f32
      %41 = vector.broadcast %cst_14 : f32 to vector<8x128xf32>
      %42 = arith.subf %41, %31 : vector<8x128xf32>
      %43 = arith.mulf %42, %39 : vector<8x128xf32>
      %44 = arith.addf %40, %43 : vector<8x128xf32>
      %cst_15 = arith.constant 0.000000e+00 : f32
      %45 = vector.broadcast %cst_15 : f32 to vector<8x128xf32>
      %46 = arith.subf %45, %44 : vector<8x128xf32>
      %cst_16 = arith.constant 0.000000e+00 : f32
      %47 = vector.broadcast %cst_16 : f32 to vector<8x128xf32>
      %48 = arith.subf %47, %46 : vector<8x128xf32>
      %49 = math.exp %48 : vector<8x128xf32>
      %cst_17 = arith.constant 2.500000e-01 : f32
      %50 = vector.broadcast %cst_17 : f32 to vector<8x128xf32>
      %51 = arith.mulf %50, %31 : vector<8x128xf32>
      %cst_18 = arith.constant 1.000000e+00 : f32
      %52 = vector.broadcast %cst_18 : f32 to vector<8x128xf32>
      %53 = arith.subf %52, %31 : vector<8x128xf32>
      %cst_19 = arith.constant 7.500000e-01 : f32
      %54 = vector.broadcast %cst_19 : f32 to vector<8x128xf32>
      %55 = arith.mulf %54, %53 : vector<8x128xf32>
      %56 = arith.addf %51, %55 : vector<8x128xf32>
      %cst_20 = arith.constant 1.000000e+00 : f32
      %57 = vector.broadcast %cst_20 : f32 to vector<8x128xf32>
      %58 = arith.subf %57, %49 : vector<8x128xf32>
      %59 = arith.mulf %58, %58 : vector<8x128xf32>
      %60 = arith.mulf %56, %59 : vector<8x128xf32>
      %61 = arith.mulf %60, %46 : vector<8x128xf32>
      %c0_21 = arith.constant 0 : index
      %c0_22 = arith.constant 0 : index
      %62 = vector.load %arg4[%c0_21, %c0_22] : memref<8x128xf32, #tpu.memory_space<vmem>>, vector<8x128xf32>
      %63 = vector.shape_cast %61 : vector<8x128xf32> to vector<1x8x128xf32>
      %cst_23 = arith.constant dense<0.000000e+00> : vector<8x128xf32>
      %64 = vector.multi_reduction <add>, %63, %cst_23 [0] : vector<1x8x128xf32> to vector<8x128xf32>
      %65 = arith.addf %62, %64 : vector<8x128xf32>
      %c0_24 = arith.constant 0 : index
      %c0_25 = arith.constant 0 : index
      %66 = vector.load %arg4[%c0_24, %c0_25] : memref<8x128xf32, #tpu.memory_space<vmem>>, vector<8x128xf32>
      tpu.vector_store %arg4[%c0_24, %c0_25], %65 {strides = array<i32>} : memref<8x128xf32, #tpu.memory_space<vmem>>, vector<8x128xf32>,
    } else {
    }
    return
  }
  func.func @transform_0(%arg0: i32, %arg1: i32) -> (i32, i32) {
    %c1_i32 = arith.constant 1 : i32
    %0 = arith.muli %arg0, %c1_i32 : i32
    %1 = arith.addi %0, %arg1 : i32
    %c0_i32 = arith.constant 0 : i32
    %2 = arith.minsi %1, %c0_i32 : i32
    %c0_i32_0 = arith.constant 0 : i32
    %c0_i32_1 = arith.constant 0 : i32
    return %2, %c0_i32_0 : i32, i32
  }
  func.func @transform_1(%arg0: i32, %arg1: i32) -> (i32, i32) {
    %c1_i32 = arith.constant 1 : i32
    %0 = arith.muli %arg0, %c1_i32 : i32
    %1 = arith.addi %0, %arg1 : i32
    %c0_i32 = arith.constant 0 : i32
    %2 = arith.minsi %1, %c0_i32 : i32
    %c0_i32_0 = arith.constant 0 : i32
    %c0_i32_1 = arith.constant 0 : i32
    return %2, %c0_i32_0 : i32, i32
  }
  func.func @transform_2(%arg0: i32, %arg1: i32) -> (i32, i32) {
    %c0_i32 = arith.constant 0 : i32
    %c0_i32_0 = arith.constant 0 : i32
    return %arg0, %c0_i32 : i32, i32
  }
}

</mosaic_0001>

<bundles_post_ra>
// kernel: tpu_custom_call.1
= control target key start
LH: loop header
LB: loop body
LE: loop exit
PB: predicated region body
PF: predicated region fallthrough
CT: control target
= control target key end

     0   :  { %7 = vsyncpa [#allocation3], 0  ;;  %s294_s0 = inlined_call_operand.hbm [shape: f32[8,128], index: 0, kind: input, shape index: {}]   ;;  %s295_s1 = inlined_call_operand.hbm [shape: f32[8,128], index: 1, kind: input, shape index: {}]   ;;  %s296_s2 = inlined_call_operand.hbm [shape: f32[8,128], index: 2, kind: output, shape index: {}]  }
   0x1   :  { %8 = vsyncpa [#allocation6], 0 }
   0x2   :  { %9 = vsyncpa [#allocation4], 0  ;;  %s240_s9 = smov [#allocation2]   ;;  %s241_s11 = smov [#allocation5]  }
   0x3   :  { %s21_s10 = sshll.u32 %s240_s9, 4  ;;  %s36_s12 = sshll.u32 %s241_s11, 4  ;;  %s22_s10 = int_to_ptr.vmem [resolvable:$true] %s21_s10  ;;  %s37_s12 = int_to_ptr.vmem [resolvable:$true] %s36_s12 }
   0x4   :  { %s168_s15 = scalar_lea.hbm %s294_s0, 128 }
   0x5   :  { %p169_p0 = scmp.ne.s32.totalorder %s294_s0, %s168_s15  ;;  %p172_p1 = scmp.lt.u32.totalorder %s168_s15, %s294_s0 }
   0x7   :  { %p174_p2 = pnand %p172_p1, %p169_p0 }
   0x9   :  { %177 = shalt.err (!%p174_p2)
}
   0xa   :  { %s178_s20 = scalar_lea.vmem %s22_s10, 128  ;;  %p183_p4 = scmp.lt.s32.totalorder %s22_s10, %s22_s10 }
   0xb   :  { %p179_p3 = scmp.ne.s32.totalorder %s22_s10, %s178_s20  ;;  %p184_p5 = scmp.lt.s32.totalorder %s178_s20, %s178_s20 }
   0xd   :  { %p185_p6 = por %p184_p5, %p183_p4 }
   0xf   :  { %p186_p7 = pnand %p185_p6, %p179_p3 }
  0x11   :  { %189 = shalt.err (!%p186_p7)
}
  0x12   :  { %24 = dma.hbm_to_vmem [thread:$0]  %s294_s0, 128, %s22_s10, [#allocation3]  }
  0x13   :  { %s190_s25 = scalar_lea.hbm %s295_s1, 128 }
  0x14   :  { %p191_p8 = scmp.ne.s32.totalorder %s295_s1, %s190_s25  ;;  %p194_p9 = scmp.lt.u32.totalorder %s190_s25, %s295_s1 }
  0x16   :  { %p196_p10 = pnand %p194_p9, %p191_p8 }
  0x18   :  { %199 = shalt.err (!%p196_p10)
}
  0x19   :  { %s200_s30 = scalar_lea.vmem %s37_s12, 128  ;;  %p205_p12 = scmp.lt.s32.totalorder %s37_s12, %s37_s12 }
  0x1a   :  { %p201_p11 = scmp.ne.s32.totalorder %s37_s12, %s200_s30  ;;  %p206_p13 = scmp.lt.s32.totalorder %s200_s30, %s200_s30 }
  0x1c   :  { %p207_p0 = por %p206_p13, %p205_p12 }
  0x1e   :  { %p208_p1 = pnand %p207_p0, %p201_p11 }
  0x20   :  { %211 = shalt.err (!%p208_p1)
}
  0x21   :  { %39 = dma.hbm_to_vmem [thread:$0]  %s295_s1, 128, %s37_s12, [#allocation6]  }
  0x22   :  { %234 = dma.done.wait [#allocation3], 128  }
  0x23   :  { %235 = vsyncadd [#allocation3], 4294967168 }
  0x24   :  { %236 = dma.done.wait [#allocation6], 128  }
  0x25   :  { %237 = vsyncadd [#allocation6], 4294967168  ;;  %v96_v0 = vlaneseq  ;;  %v108_v3 = vld [vmem:[#allocation2] sm:$0xff]  ;;  %v110_v6 = vld [vmem:[#allocation5] sm:$0xff]  ;;  %s242_s1 = smov [#allocation7]  }
  0x26   :  { %s144_s4 = sshll.u32 %s242_s1, 4  ;;  %s145_s4 = int_to_ptr.vmem [resolvable:$true] %s144_s4 }
  0x27   :  { %v97_v1 = vshrl.u32 %v96_v0, 7  ;;  %v103_v2 = vand.u32 127, %v96_v0  ;;  %s212_s5 = scalar_lea.vmem %s145_s4, 128  ;;  %p217_p3 = scmp.lt.s32.totalorder %s145_s4, %s145_s4 }
  0x28   :  { %p213_p2 = scmp.ne.s32.totalorder %s145_s4, %s212_s5  ;;  %p218_p4 = scmp.lt.s32.totalorder %s212_s5, %s212_s5 }
  0x29   :  { %vm101_vm0 = vcmp.lt.s32.totalorder %v97_v1, 7  ;;  %vm104_vm1 = vcmp.eq.s32.totalorder %v97_v1, 7  ;;  %vm105_vm2 = vcmp.lt.s32.totalorder %v103_v2, 104 }
  0x2a   :  { %vm106_vm3 = vmand %vm104_vm1, %vm105_vm2  ;;  %p219_p5 = por %p218_p4, %p217_p3 }
  0x2b   :  { %vm107_vm4 = vmor %vm101_vm0, %vm106_vm3 }
  0x2c   :  { %v109_v4 = vsel %vm107_vm4, %v108_v3, 1.0  ;;  %v111_v8 = vsel %vm107_vm4, %v110_v6, 1.0  ;;  %p220_p6 = pnand %p219_p5, %p213_p2 }
  0x2d   :  { %162 = vlog2.f32 %v109_v4  ;;  %v115_v5 = vsub.f32 1.0, %v109_v4  ;;  %v120_v13 = vsub.f32 1.0, %v111_v8  ;;  %v127_v21 = vmul.f32 0.25, %v111_v8 }
  0x2f   :  { %164 = vlog2.f32 %v115_v5  ;;  %v128_v22 = vmul.f32 0.75, %v120_v13 }
  0x31   :  { %v129_v24 = vadd.f32 %v128_v22, %v127_v21 }
  0x37   :  { %v163_v7 = vpop.eup %162 }
  0x38   :  { %v113_v9 = vmul.f32 0.6931472, %v163_v7 }
  0x39   :  { %v165_v10 = vpop.eup %164 }
  0x3a   :  { %v114_v11 = vmax.f32 %v113_v9, -100.0  ;;  %v117_v12 = vmul.f32 0.6931472, %v165_v10 }
  0x3c   :  { %v118_v14 = vmax.f32 %v117_v12, -100.0  ;;  %v119_v15 = vmul.f32 %v114_v11, %v111_v8 }
  0x3e   :  { %v121_v16 = vmul.f32 %v120_v13, %v118_v14 }
  0x40   :  { %v122_v17 = vadd.f32 %v121_v16, %v119_v15 }
  0x42   :  { %v123_v18 = vsub.f32 0.0, %v122_v17 }
  0x44   :  { %v124_v19 = vsub.f32 0.0, %v123_v18 }
  0x46   :  { %v125_v20 = vmul.f32 1.442695, %v124_v19 }
  0x48   :  { %166 = vpow2.f32 %v125_v20 }
  0x52   :  { %v167_v23 = vpop.eup %166 }
  0x53   :  { %v130_v25 = vsub.f32 1.0, %v167_v23 }
  0x55   :  { %v131_v26 = vmul.f32 %v130_v25, %v130_v25 }
  0x57   :  { %v132_v27 = vmul.f32 %v131_v26, %v129_v24 }
  0x59   :  { %v133_v28 = vmul.f32 %v132_v27, %v123_v18 }
  0x5b   :  { %137 = vst [vmem:[#allocation7] sm:$0xff] %v133_v28 }
  0x5c   :  { %223 = shalt.err (!%p220_p6)
}
  0x5d   :  { %s224_s8 = scalar_lea.hbm %s296_s2, 128 }
  0x5e   :  { %p225_p7 = scmp.ne.s32.totalorder %s296_s2, %s224_s8  ;;  %p228_p8 = scmp.lt.u32.totalorder %s224_s8, %s296_s2 }
  0x60   :  { %p230_p9 = pnand %p228_p8, %p225_p7 }
  0x62   :  { %233 = shalt.err (!%p230_p9)
}
  0x63   :  { %147 = dma.vmem_to_hbm [thread:$0]  %s145_s4, 128, %s296_s2, [#allocation4]  }
  0x64   :  { %238 = dma.done.wait [#allocation4], 128  }
  0x65   :  { %239 = vsyncadd [#allocation4], 4294967168 }
  0x66   :  { %151 = vsyncpa [#allocation3], 1 }
  0x67   :  { %152 = vsyncpa [#allocation6], 1 }
  0x68   :  { %153 = vsyncpa [#allocation4], 1 }

</bundles_post_ra>
